<compile_context>
chip_gen: v7x
topology: tpu7x:2x2x1
jax: 0.10.0
libtpu: 0.0.40
codegen_flags: <defaults>
</compile_context>

<pallas_src>
import functools

import jax
import jax.numpy as jnp
from jax.experimental import pallas as pl
from jax.experimental.pallas import tpu as pltpu


def _always_kernel(v_ref, o_ref):
    # Single scalar copy on the scalar path: SMEM load -> SMEM store.
    # No vector ops, no DMA, no grid.
    o_ref[0, 0] = v_ref[0, 0]


@functools.lru_cache(maxsize=None)
def _compiled_always(dtype_name: str):
    """One memoized Mosaic compile per (32-bit) dtype, shared across instances."""
    dtype = jnp.dtype(dtype_name)
    return pl.pallas_call(
        _always_kernel,
        out_shape=jax.ShapeDtypeStruct((1, 1), dtype),
        in_specs=[pl.BlockSpec(memory_space=pltpu.SMEM)],
        out_specs=pl.BlockSpec(memory_space=pltpu.SMEM),
    )


def make_always(val, dtype=jnp.float32):
    """Builds a callable equivalent to Always(val).forward(*args, **kwargs).

    `val` must be a numeric scalar.
    """
    # TODO(synk): the PyTorch Always can store arbitrary objects (tensors,
    # None, ...); only numeric scalars are supported here.
    dtype = jnp.dtype(dtype)

    # SMEM scalar stores are 32-bit: run the kernel in a 32-bit container and
    # cast the cached scalar once at build time if a narrower dtype was asked.
    if dtype.itemsize == 4:
        compute_dtype = dtype
    elif jnp.issubdtype(dtype, jnp.floating):
        compute_dtype = jnp.dtype(jnp.float32)
    else:
        compute_dtype = jnp.dtype(jnp.int32)

    pallas_fn = _compiled_always(compute_dtype.name)
    val_arr = jnp.full((1, 1), val, dtype=compute_dtype)

    # Run the memoized kernel exactly once at build time; fold the squeeze
    # into the indexing (no separate jnp.squeeze program).
    cached = pallas_fn(val_arr)[0, 0]
    if cached.dtype != dtype:
        cached = cached.astype(dtype)
    cached = jax.block_until_ready(cached)

    def forward(*args, **kwargs):
        # All positional / keyword args are ignored, as in the PyTorch module.
        del args, kwargs
        return cached

    return forward


if __name__ == "__main__":
    key = jax.random.PRNGKey(0)

    # Deterministic "constant" stored by the module.
    const_val = 0.125

    # Small example input, consistent with a typical NCHW activation a caller
    # might pass to forward(); it is ignored by design.
    x = jax.random.normal(key, (2, 4, 16, 16), dtype=jnp.float32)

    always = make_always(const_val, dtype=jnp.float32)
    out = jax.block_until_ready(always(x))

    assert out.shape == (), f"expected scalar output, got shape {out.shape}"
    assert jnp.allclose(out, jnp.float32(const_val)), f"mismatch: {out} vs {const_val}"

    # Repeated calls reuse the cached constant (no extra kernel launches).
    out2 = jax.block_until_ready(always(x, extra_kwarg=123))
    assert jnp.allclose(out2, jnp.float32(const_val))

    # A second Always instance with a different value reuses the same compiled
    # kernel (lru_cache) — only one Mosaic compile for any number of instances.
    always2 = make_always(-3.0, dtype=jnp.float32)
    out3 = jax.block_until_ready(always2(x))
    assert jnp.allclose(out3, jnp.float32(-3.0)), f"mismatch: {out3} vs -3.0"
    assert _compiled_always.cache_info().misses == 1, "kernel was recompiled"

    print("KERNEL_OK")
</pallas_src>

<mosaic_0001>
module attributes {stable_mosaic.version = 11 : i64} {
  func.func @_always_kernel(%arg0: memref<1x1xf32, #tpu.memory_space<smem>>, %arg1: memref<1x1xf32, #tpu.memory_space<smem>>) attributes {dimension_semantics = [], scalar_prefetch = 0 : i64, scratch_operands = 0 : i64, tpu.core_type = #tpu.core_type<tc>} {
    %c0 = arith.constant 0 : index
    %c0_0 = arith.constant 0 : index
    %0 = memref.load %arg0[%c0, %c0_0] : memref<1x1xf32, #tpu.memory_space<smem>>
    %c0_1 = arith.constant 0 : index
    %c0_2 = arith.constant 0 : index
    %1 = memref.load %arg1[%c0_1, %c0_2] : memref<1x1xf32, #tpu.memory_space<smem>>
    memref.store %0, %arg1[%c0_1, %c0_2] : memref<1x1xf32, #tpu.memory_space<smem>>
    return
  }
}

</mosaic_0001>

<bundles_post_ra>
// kernel: tpu_custom_call.1
= control target key start
LH: loop header
LB: loop body
LE: loop exit
PB: predicated region body
PF: predicated region fallthrough
CT: control target
= control target key end

     0   :  { %7 = vsyncpa [#allocation4], 0  ;;  %s65_s0 = inlined_call_operand.<no memory space> [shape: f32[1,1], index: 0, kind: input, shape index: {}]   ;;  %s66_s1 = inlined_call_operand.hbm [shape: f32[1,1], index: 1, kind: output, shape index: {}]  }
   0x1   :  { %12 = sst [smem:[#allocation3]] %s65_s0  ;;  %s27_s10 = scalar_lea.hbm %s66_s1, 16 }
   0x2   :  { %p28_p0 = scmp.ne.s32.totalorder %s66_s1, %s27_s10  ;;  %p31_p1 = scmp.lt.u32.totalorder %s27_s10, %s66_s1 }
   0x4   :  { %p33_p2 = pnand %p31_p1, %p28_p0 }
   0x6   :  { %36 = shalt.err (!%p33_p2)
}
   0x7   :  { %s39_s15 = smov [#allocation3]  }
   0x8   :  { %20 = dma.smem_to_hbm %s39_s15, 16, %s66_s1, [#allocation4]  }
   0x9   :  { %37 = dma.done.wait [#allocation4], 16  }
   0xa   :  { %38 = vsyncadd [#allocation4], 4294967280 }
   0xb   :  { %24 = sfence }
   0xc   :  { %25 = vsyncpa [#allocation4], 1 }

</bundles_post_ra>
